<compile_context>
chip_gen: v7x
topology: tpu7x:2x2x1
jax: 0.10.0
libtpu: 0.0.40
codegen_flags: <defaults>
</compile_context>

<pallas_src>
import jax
import jax.numpy as jnp
from jax import lax
from jax.experimental import pallas as pl
from jax.experimental.pallas import tpu as pltpu


# ----------------------------------------------------------------------------------
# hardware-dependent budgets
# ----------------------------------------------------------------------------------
def _vmem_capacity_bytes():
    """Physical per-core VMEM (v5e/v6e: 128 MiB, v7x: 64 MiB); conservative fallback."""
    try:
        info = pltpu.get_tpu_info()
        cap = int(getattr(info, "vmem_capacity_bytes", 0))
        if cap > 0:
            return cap
    except Exception:
        pass
    return 64 * 1024 * 1024


def _pick_rows(budget_bytes, bytes_per_row, cap=1024):
    """Largest multiple-of-8 row tile fitting the budget (cap keeps v7x headroom)."""
    t = budget_bytes // max(1, bytes_per_row)
    return int(max(8, min(cap, (t // 8) * 8)))


# ----------------------------------------------------------------------------------
# fused single-shot kernel (everything VMEM resident; embeds read from HBM once)
# ----------------------------------------------------------------------------------
def _make_fused_kernel(n_total):
    inv_n = 1.0 / float(n_total)

    def kernel(x_ref, w_ref, b_ref, att_ref, z_ref):
        x = x_ref[...]                                     # (V, R, L) native dtype
        V, R, L = x.shape
        # fc + tanh: one 2-D MXU matmul, f32 accumulation (no full-tensor upcast of x).
        h = jnp.dot(x.reshape(V * R, L), w_ref[...],
                    preferred_element_type=jnp.float32)
        h = jnp.tanh(h + b_ref[...].astype(jnp.float32)).reshape(V, R, L)
        sp = jnp.sum(h, axis=1) * inv_n                    # (V, L) f32, mean over true N
        scores = jnp.sum(sp * att_ref[...].astype(jnp.float32),
                         axis=-1, keepdims=True)           # (V, 1)
        m = jnp.max(scores, axis=0, keepdims=True)
        e = jnp.exp(scores - m)
        beta = e / jnp.sum(e, axis=0, keepdims=True)       # exact softmax over views
        # per-view weighted sum: one (R, L) f32 temp at a time (no full f32 copy of x).
        acc = x[0].astype(jnp.float32) * beta[0]
        for v in range(1, V):
            acc = acc + x[v].astype(jnp.float32) * beta[v]
        z_ref[...] = acc.astype(z_ref.dtype)

    return kernel


# ----------------------------------------------------------------------------------
# tiled phase A: per-core accumulation of sum_rows tanh(x @ W + b)
# ----------------------------------------------------------------------------------
def _make_phase_a_kernel(r_total, tiles_total, tile_rows):
    needs_mask = (r_total % tile_rows) != 0                # trace-time flag

    def kernel(x_ref, w_ref, b_ref, spsum_ref):
        c = pl.program_id(0)
        t = pl.program_id(1)
        t_per_core = pl.num_programs(1)

        @pl.when(t == 0)
        def _init():
            spsum_ref[...] = jnp.zeros_like(spsum_ref)

        x = x_ref[...]                                     # (V, TR, L) native dtype
        V, TR, L = x.shape
        h = jnp.dot(x.reshape(V * TR, L), w_ref[...],      # single 2-D MXU matmul
                    preferred_element_type=jnp.float32)
        h = jnp.tanh(h + b_ref[...].astype(jnp.float32)).reshape(V, TR, L)

        if not needs_mask:
            spsum_ref[...] += jnp.sum(h, axis=1)[None]
        else:
            tile_idx = c * t_per_core + t

            @pl.when(tile_idx < tiles_total - 1)           # full tiles: no mask cost
            def _full():
                spsum_ref[...] += jnp.sum(h, axis=1)[None]

            @pl.when(tile_idx == tiles_total - 1)          # boundary tile: mask garbage
            def _partial():
                row = lax.broadcasted_iota(jnp.int32, (1, TR, 1), 1) + tile_idx * TR
                hm = jnp.where(row < r_total, h, 0.0)
                spsum_ref[...] += jnp.sum(hm, axis=1)[None]

    return kernel


def _phase_a(x, w_big, b_big, *, tile_rows, vmem_limit):
    V, R, L = x.shape
    nt = pl.cdiv(R, tile_rows)
    # v7x megacore: split row tiles across the two TensorCores when they divide evenly
    # (on single-core chips the "parallel" axis just runs sequentially; disjoint outputs).
    n_cores = 2 if (nt >= 2 and nt % 2 == 0) else 1
    t_per_core = nt // n_cores

    return pl.pallas_call(
        _make_phase_a_kernel(R, nt, tile_rows),
        out_shape=jax.ShapeDtypeStruct((n_cores, V, L), jnp.float32),
        grid_spec=pltpu.PrefetchScalarGridSpec(
            num_scalar_prefetch=0,
            grid=(n_cores, t_per_core),
            in_specs=[
                pl.BlockSpec((V, tile_rows, L), lambda c, t: (0, c * t_per_core + t, 0)),
                pl.BlockSpec((L, L), lambda c, t: (0, 0)),
                pl.BlockSpec((1, L), lambda c, t: (0, 0)),
            ],
            out_specs=pl.BlockSpec((1, V, L), lambda c, t: (c, 0, 0)),
        ),
        compiler_params=pltpu.CompilerParams(
            dimension_semantics=("parallel", "arbitrary"),
            vmem_limit_bytes=vmem_limit),
    )(x, w_big, b_big)


# ----------------------------------------------------------------------------------
# tiled phase B: z = sum_v beta_v * x_v (per-view accumulation, lane-dense output)
# ----------------------------------------------------------------------------------
def _weighted_sum_kernel(beta_ref, x_ref, z_ref):
    beta = beta_ref[...]                                   # (V, 1) f32
    V = beta.shape[0]
    acc = x_ref[0].astype(jnp.float32) * beta[0]
    for v in range(1, V):
        acc = acc + x_ref[v].astype(jnp.float32) * beta[v]
    z_ref[...] = acc.astype(z_ref.dtype)


def _phase_b(beta, x, out_dtype, *, tile_rows, vmem_limit):
    V, R, L = x.shape
    return pl.pallas_call(
        _weighted_sum_kernel,
        out_shape=jax.ShapeDtypeStruct((R, L), out_dtype),
        grid_spec=pltpu.PrefetchScalarGridSpec(
            num_scalar_prefetch=0,
            grid=(pl.cdiv(R, tile_rows),),
            in_specs=[
                pl.BlockSpec((V, 1), lambda t: (0, 0)),
                pl.BlockSpec((V, tile_rows, L), lambda t: (0, t, 0)),
            ],
            out_specs=pl.BlockSpec((tile_rows, L), lambda t: (t, 0)),
        ),
        compiler_params=pltpu.CompilerParams(
            dimension_semantics=("parallel",),
            vmem_limit_bytes=vmem_limit),
    )(beta, x)


# ----------------------------------------------------------------------------------
# public wrapper
# ----------------------------------------------------------------------------------
def attention_forward(embeds, w, b, att, *, force_tiled=False, tile_a=None, tile_b=None):
    """embeds: (V, N, H); w: (H, H) PyTorch (out,in) layout; b: (1,H); att: (1,H) -> (N, H)."""
    V, N, H = embeds.shape
    dt = embeds.dtype
    isz = jnp.dtype(dt).itemsize

    # Lane-dense "packed" presentation: pack G = 128//H consecutive nodes per 128-lane
    # row and apply fc through a block-diagonal (128,128) weight.  Falls back to the
    # natural (V, N, H) layout when the shapes don't allow it.
    packed = (H <= 128) and (128 % H == 0) and (N % (128 // H) == 0)
    w_t = jnp.transpose(w).astype(dt)                      # (H_in, H_out), tiny one-time
    if packed:
        G = 128 // H
        L, R = 128, N // G
        x = embeds.reshape(V, R, L)                        # contiguous merge: no HBM copy
        w_big = jnp.kron(jnp.eye(G, dtype=dt), w_t)        # (128,128) block-diagonal
        b_big = jnp.tile(jnp.reshape(b, (1, H)).astype(jnp.float32), (1, G))
        att_big = jnp.tile(jnp.reshape(att, (1, H)).astype(jnp.float32), (1, G))
    else:
        G, L, R = 1, H, N
        x = embeds
        w_big = w_t
        b_big = jnp.reshape(b, (1, H)).astype(jnp.float32)
        att_big = jnp.reshape(att, (1, H)).astype(jnp.float32)

    # generation-dependent budgets (v5e/v6e: 128 MiB VMEM -> wide fused regime; v7x: 64 MiB)
    cap = _vmem_capacity_bytes()
    vmem_limit = int(min(cap * 3 // 4, 100 << 20))
    fused_threshold = cap * 35 // 100
    tile_budget = cap // 2

    l_pad = pl.cdiv(L, 128) * 128                          # lane padding of the minor axis
    # actual fused-path VMEM footprint: x + f32 h + f32 acc + output (all lane-padded)
    fused_bytes = R * l_pad * (V * (isz + 4) + isz + 4)

    if (not force_tiled) and fused_bytes <= fused_threshold:
        z = pl.pallas_call(
            _make_fused_kernel(N),
            out_shape=jax.ShapeDtypeStruct((R, L), dt),
            in_specs=[pl.BlockSpec(memory_space=pltpu.MemorySpace.VMEM)] * 4,
            out_specs=pl.BlockSpec(memory_space=pltpu.MemorySpace.VMEM),
            compiler_params=pltpu.CompilerParams(vmem_limit_bytes=vmem_limit),
        )(x, w_big, b_big, att_big)
        return z.reshape(N, H)

    # ---------------- tiled two-phase path ----------------
    # phase A: accumulate sum_rows tanh(fc(x)) per view (double-buffered x + f32 h budget)
    bytes_per_row_a = V * l_pad * (2 * isz + 4)
    tr_a = tile_a if tile_a is not None else _pick_rows(tile_budget, bytes_per_row_a)
    tr_a = min(int(tr_a), R)
    if tr_a < R:
        tr_a = max(8, (tr_a // 8) * 8)
        if tile_a is None:                                 # nudge tile count even -> 2-TC split
            nt = pl.cdiv(R, tr_a)
            if nt > 1 and nt % 2 == 1:
                cand = max(8, ((pl.cdiv(R, nt + 1) + 7) // 8) * 8)
                if pl.cdiv(R, cand) % 2 == 0:
                    tr_a = cand

    spsum_parts = _phase_a(x, w_big, b_big, tile_rows=tr_a, vmem_limit=vmem_limit)

    # finalize beta exactly in plain JAX (V scalars): mean over TRUE N, score, softmax.
    sp = jnp.sum(spsum_parts, axis=0)                      # (V, L) f32
    scores = jnp.sum(sp * att_big, axis=-1) * (1.0 / N)    # (V,)
    beta = jax.nn.softmax(scores, axis=0).reshape(V, 1).astype(jnp.float32)

    # phase B: weighted sum, lane-dense output, megacore-parallel
    bytes_per_row_b = V * l_pad * 2 * isz + l_pad * (4 + 2 * isz)
    tr_b = tile_b if tile_b is not None else _pick_rows(tile_budget, bytes_per_row_b)
    tr_b = min(int(tr_b), R)
    if tr_b < R:
        tr_b = max(8, (tr_b // 8) * 8)

    z = _phase_b(beta, x, dt, tile_rows=tr_b, vmem_limit=vmem_limit)
    return z.reshape(N, H)


# ----------------------------------------------------------------------------------
# self-test
# ----------------------------------------------------------------------------------
def _reference(embeds, w, b, att):
    h = jnp.tanh(jnp.einsum('vnh,kh->vnk', embeds, w) + jnp.reshape(b, (1, 1, -1)))
    sp = h.mean(axis=1)
    beta = jax.nn.softmax(jnp.sum(sp * jnp.reshape(att, (1, -1)), axis=-1), axis=0)
    return jnp.einsum('v,vnh->nh', beta, embeds)


def _make_inputs(key, V, N, H):
    k1, k2, k3, k4 = jax.random.split(key, 4)
    gain = 1.414
    # fc.weight: xavier_normal_(gain=1.414) on (H, H)
    w = (gain * (2.0 / (H + H)) ** 0.5) * jax.random.normal(k1, (H, H), jnp.float32)
    # fc.bias: default nn.Linear init U(-1/sqrt(fan_in), 1/sqrt(fan_in))
    bound = 1.0 / (H ** 0.5)
    b = jax.random.uniform(k2, (1, H), jnp.float32, -bound, bound)
    # att: xavier_normal_(gain=1.414) on (1, H)
    att = (gain * (2.0 / (H + 1)) ** 0.5) * jax.random.normal(k3, (1, H), jnp.float32)
    embeds = jax.random.normal(k4, (V, N, H), jnp.float32)
    return embeds, w, b, att


if __name__ == "__main__":
    key = jax.random.PRNGKey(0)
    k_a, k_b, k_c = jax.random.split(key, 3)
    atol = rtol = 5e-4

    # --- test 1: small packed shape; fused fast path AND forced tiled path ---
    V, N, H = 3, 8, 32
    embeds, w, b, att = _make_inputs(k_a, V, N, H)
    z_fast = attention_forward(embeds, w, b, att)
    z_tile = attention_forward(embeds, w, b, att, force_tiled=True)
    jax.block_until_ready((z_fast, z_tile))
    z_ref = _reference(embeds, w, b, att)
    assert jnp.allclose(z_fast, z_ref, atol=atol, rtol=rtol), "fused (packed) mismatch"
    assert jnp.allclose(z_tile, z_ref, atol=atol, rtol=rtol), "tiled (packed) mismatch"

    # --- test 2: multi-tile packed grid, partial last tiles, 2-way core-split logic ---
    V2, N2, H2 = 4, 200, 32
    embeds2, w2, b2, att2 = _make_inputs(k_b, V2, N2, H2)
    z2 = attention_forward(embeds2, w2, b2, att2, force_tiled=True, tile_a=16, tile_b=16)
    jax.block_until_ready(z2)
    assert jnp.allclose(z2, _reference(embeds2, w2, b2, att2), atol=atol, rtol=rtol), \
        "multi-tile (packed) mismatch"

    # --- test 3: unpacked fallback (N not divisible by 128//H); fused and tiled ---
    V3, N3, H3 = 2, 13, 32
    embeds3, w3, b3, att3 = _make_inputs(k_c, V3, N3, H3)
    z3a = attention_forward(embeds3, w3, b3, att3)
    z3b = attention_forward(embeds3, w3, b3, att3, force_tiled=True)
    jax.block_until_ready((z3a, z3b))
    z3_ref = _reference(embeds3, w3, b3, att3)
    assert jnp.allclose(z3a, z3_ref, atol=atol, rtol=rtol), "fused (fallback) mismatch"
    assert jnp.allclose(z3b, z3_ref, atol=atol, rtol=rtol), "tiled (fallback) mismatch"

    print("KERNEL_OK")
</pallas_src>

<mosaic_0001>
module attributes {stable_mosaic.version = 11 : i64} {
  func.func @kernel(%arg0: memref<3x2x128xf32, #tpu.memory_space<vmem>>, %arg1: memref<128x128xf32, #tpu.memory_space<vmem>>, %arg2: memref<1x128xf32, #tpu.memory_space<vmem>>, %arg3: memref<1x128xf32, #tpu.memory_space<vmem>>, %arg4: memref<2x128xf32, #tpu.memory_space<vmem>>) attributes {dimension_semantics = [], scalar_prefetch = 0 : i64, scratch_operands = 0 : i64, tpu.core_type = #tpu.core_type<tc>} {
    %c0 = arith.constant 0 : index
    %c0_0 = arith.constant 0 : index
    %c0_1 = arith.constant 0 : index
    %0 = vector.load %arg0[%c0, %c0_0, %c0_1] : memref<3x2x128xf32, #tpu.memory_space<vmem>>, vector<3x2x128xf32>
    %1 = vector.shape_cast %0 : vector<3x2x128xf32> to vector<6x128xf32>
    %c0_2 = arith.constant 0 : index
    %c0_3 = arith.constant 0 : index
    %2 = vector.load %arg1[%c0_2, %c0_3] : memref<128x128xf32, #tpu.memory_space<vmem>>, vector<128x128xf32>
    %cst = arith.constant dense<0.000000e+00> : vector<6x128xf32>
    %3 = tpu.matmul %1, %2, %cst {dimension_numbers = #tpu.dot_dimension_numbers<[1], [0], [0], [1], [0, 0, 1, 1], [], []>} : vector<6x128xf32>, vector<128x128xf32>, vector<6x128xf32> -> vector<6x128xf32>
    %c0_4 = arith.constant 0 : index
    %c0_5 = arith.constant 0 : index
    %4 = vector.load %arg2[%c0_4, %c0_5] : memref<1x128xf32, #tpu.memory_space<vmem>>, vector<1x128xf32>
    %5 = vector.broadcast %4 : vector<1x128xf32> to vector<6x128xf32>
    %6 = arith.addf %3, %5 : vector<6x128xf32>
    %7 = math.tanh %6 : vector<6x128xf32>
    %8 = vector.shape_cast %7 : vector<6x128xf32> to vector<3x2x128xf32>
    %cst_6 = arith.constant dense<0.000000e+00> : vector<3x128xf32>
    %9 = vector.multi_reduction <add>, %8, %cst_6 [1] : vector<3x2x128xf32> to vector<3x128xf32>
    %cst_7 = arith.constant 1.250000e-01 : f32
    %10 = vector.broadcast %cst_7 : f32 to vector<3x128xf32>
    %11 = arith.mulf %9, %10 : vector<3x128xf32>
    %c0_8 = arith.constant 0 : index
    %c0_9 = arith.constant 0 : index
    %12 = vector.load %arg3[%c0_8, %c0_9] : memref<1x128xf32, #tpu.memory_space<vmem>>, vector<1x128xf32>
    %13 = vector.broadcast %12 : vector<1x128xf32> to vector<3x128xf32>
    %14 = arith.mulf %11, %13 : vector<3x128xf32>
    %cst_10 = arith.constant dense<0.000000e+00> : vector<3xf32>
    %15 = vector.multi_reduction <add>, %14, %cst_10 [1] : vector<3x128xf32> to vector<3xf32>
    %16 = vector.shape_cast %15 : vector<3xf32> to vector<3x1xf32>
    %cst_11 = arith.constant dense<0xFF800000> : vector<1xf32>
    %17 = vector.multi_reduction <maximumf>, %16, %cst_11 [0] : vector<3x1xf32> to vector<1xf32>
    %18 = vector.shape_cast %17 : vector<1xf32> to vector<1x1xf32>
    %19 = vector.broadcast %18 : vector<1x1xf32> to vector<3x1xf32>
    %20 = arith.subf %16, %19 : vector<3x1xf32>
    %21 = math.exp %20 : vector<3x1xf32>
    %cst_12 = arith.constant dense<0.000000e+00> : vector<1xf32>
    %22 = vector.multi_reduction <add>, %21, %cst_12 [0] : vector<3x1xf32> to vector<1xf32>
    %23 = vector.shape_cast %22 : vector<1xf32> to vector<1x1xf32>
    %24 = vector.broadcast %23 : vector<1x1xf32> to vector<3x1xf32>
    %25 = arith.divf %21, %24 : vector<3x1xf32>
    %26 = vector.extract_strided_slice %0 {offsets = [0, 0, 0], sizes = [1, 2, 128], strides = [1, 1, 1]} : vector<3x2x128xf32> to vector<1x2x128xf32>
    %27 = vector.shape_cast %26 : vector<1x2x128xf32> to vector<2x128xf32>
    %28 = vector.extract_strided_slice %25 {offsets = [0, 0], sizes = [1, 1], strides = [1, 1]} : vector<3x1xf32> to vector<1x1xf32>
    %29 = vector.shape_cast %28 : vector<1x1xf32> to vector<1xf32>
    %30 = vector.shape_cast %29 : vector<1xf32> to vector<1x1xf32>
    %31 = vector.broadcast %30 : vector<1x1xf32> to vector<2x128xf32>
    %32 = arith.mulf %27, %31 : vector<2x128xf32>
    %33 = vector.extract_strided_slice %0 {offsets = [1, 0, 0], sizes = [1, 2, 128], strides = [1, 1, 1]} : vector<3x2x128xf32> to vector<1x2x128xf32>
    %34 = vector.shape_cast %33 : vector<1x2x128xf32> to vector<2x128xf32>
    %35 = vector.extract_strided_slice %25 {offsets = [1, 0], sizes = [1, 1], strides = [1, 1]} : vector<3x1xf32> to vector<1x1xf32>
    %36 = vector.shape_cast %35 : vector<1x1xf32> to vector<1xf32>
    %37 = vector.shape_cast %36 : vector<1xf32> to vector<1x1xf32>
    %38 = vector.broadcast %37 : vector<1x1xf32> to vector<2x128xf32>
    %39 = arith.mulf %34, %38 : vector<2x128xf32>
    %40 = arith.addf %32, %39 : vector<2x128xf32>
    %41 = vector.extract_strided_slice %0 {offsets = [2, 0, 0], sizes = [1, 2, 128], strides = [1, 1, 1]} : vector<3x2x128xf32> to vector<1x2x128xf32>
    %42 = vector.shape_cast %41 : vector<1x2x128xf32> to vector<2x128xf32>
    %43 = vector.extract_strided_slice %25 {offsets = [2, 0], sizes = [1, 1], strides = [1, 1]} : vector<3x1xf32> to vector<1x1xf32>
    %44 = vector.shape_cast %43 : vector<1x1xf32> to vector<1xf32>
    %45 = vector.shape_cast %44 : vector<1xf32> to vector<1x1xf32>
    %46 = vector.broadcast %45 : vector<1x1xf32> to vector<2x128xf32>
    %47 = arith.mulf %42, %46 : vector<2x128xf32>
    %48 = arith.addf %40, %47 : vector<2x128xf32>
    %c0_13 = arith.constant 0 : index
    %c0_14 = arith.constant 0 : index
    %49 = vector.load %arg4[%c0_13, %c0_14] : memref<2x128xf32, #tpu.memory_space<vmem>>, vector<2x128xf32>
    tpu.vector_store %arg4[%c0_13, %c0_14], %48 {strides = array<i32>} : memref<2x128xf32, #tpu.memory_space<vmem>>, vector<2x128xf32>,
    return
  }
}

</mosaic_0001>

<bundles_post_ra>
// kernel: tpu_custom_call.1
= control target key start
LH: loop header
LB: loop body
LE: loop exit
PB: predicated region body
PF: predicated region fallthrough
CT: control target
= control target key end

     0   :  { %9 = vsyncpa [#allocation3], 0  ;;  %s551_s0 = inlined_call_operand.hbm [shape: f32[3,2,128], index: 0, kind: input, shape index: {}]   ;;  %s552_s1 = inlined_call_operand.hbm [shape: f32[128,128], index: 1, kind: input, shape index: {}]   ;;  %s553_s2 = inlined_call_operand.vmem [shape: f32[1,128], index: 2, kind: input, shape index: {}]   ;;  %s554_s3 = inlined_call_operand.vmem [shape: f32[1,128], index: 3, kind: input, shape index: {}]   ;;  %s555_s4 = inlined_call_operand.hbm [shape: f32[2,128], index: 4, kind: output, shape index: {}]  }
   0x1   :  { %10 = vsyncpa [#allocation6], 0 }
   0x2   :  { %11 = vsyncpa [#allocation4], 0  ;;  %s452_s15 = smov [#allocation2]   ;;  %s380_s19 = scalar_lea.hbm %s551_s0, 96 }
   0x3   :  { %s17_s16 = sshll.u32 %s452_s15, 4  ;;  %p381_p0 = scmp.ne.s32.totalorder %s551_s0, %s380_s19  ;;  %s18_s16 = int_to_ptr.vmem [resolvable:$true] %s17_s16 }
   0x4   :  { %p384_p1 = scmp.lt.u32.totalorder %s380_s19, %s551_s0 }
   0x6   :  { %p386_p2 = pnand %p384_p1, %p381_p0 }
   0x8   :  { %389 = shalt.err (!%p386_p2)
}
   0x9   :  { %s390_s24 = scalar_lea.vmem %s18_s16, 96  ;;  %p395_p4 = scmp.lt.s32.totalorder %s18_s16, %s18_s16 }
   0xa   :  { %p391_p3 = scmp.ne.s32.totalorder %s18_s16, %s390_s24  ;;  %p396_p5 = scmp.lt.s32.totalorder %s390_s24, %s390_s24 }
   0xc   :  { %p397_p6 = por %p396_p5, %p395_p4 }
   0xe   :  { %p398_p7 = pnand %p397_p6, %p391_p3 }
  0x10   :  { %401 = shalt.err (!%p398_p7)
}
  0x11   :  { %s453_s25 = smov 32   ;;  %s454_s26 = smov 2  }
  0x12   :  { %23 = dma.hbm_to_vmem [thread:$0]  %s551_s0, 96, %s18_s16, [#allocation3], %s453_s25, %s453_s25, %s454_s26  }
  0x13   :  { %s455_s29 = smov [#allocation5]   ;;  %s402_s7 = scalar_lea.hbm %s552_s1, 2048 }
  0x14   :  { %s29_s30 = sshll.u32 %s455_s29, 4  ;;  %p403_p8 = scmp.ne.s32.totalorder %s552_s1, %s402_s7  ;;  %s30_s30 = int_to_ptr.vmem [resolvable:$true] %s29_s30 }
  0x15   :  { %p406_p9 = scmp.lt.u32.totalorder %s402_s7, %s552_s1 }
  0x17   :  { %p408_p10 = pnand %p406_p9, %p403_p8 }
  0x19   :  { %411 = shalt.err (!%p408_p10)
}
  0x1a   :  { %s412_s12 = scalar_lea.vmem %s30_s30, 2048  ;;  %p417_p12 = scmp.lt.s32.totalorder %s30_s30, %s30_s30 }
  0x1b   :  { %p413_p11 = scmp.ne.s32.totalorder %s30_s30, %s412_s12  ;;  %p418_p13 = scmp.lt.s32.totalorder %s412_s12, %s412_s12 }
  0x1d   :  { %p419_p0 = por %p418_p13, %p417_p12 }
  0x1f   :  { %p420_p1 = pnand %p419_p0, %p413_p11 }
  0x21   :  { %423 = shalt.err (!%p420_p1)
}
  0x22   :  { %s456_s0 = smov 128   ;;  %s457_s13 = smov 8  }
  0x23   :  { %35 = dma.hbm_to_vmem [thread:$0]  %s552_s1, 2048, %s30_s30, [#allocation6], %s456_s0, %s456_s0, %s457_s13  }
  0x24   :  { %446 = dma.done.wait [#allocation3], 96  }
  0x25   :  { %447 = vsyncadd [#allocation3], 4294967200 }
  0x26   :  { %448 = dma.done.wait [#allocation6], 2048  }
  0x27   :  { %449 = vsyncadd [#allocation6], 4294965248  ;;  %v458_v0 = vmov 0.0|0.0   ;;  %vm459_vm0 = vmmov 0   ;;  %v460_v1 = vmov 0.0   ;;  %v49_v2 = vld [vmem:[#allocation5] sm:$0xff]  ;;  %v79_v18 = vlaneseq }
  0x28   :  { %339 = vmatprep.subr.bf16.mxu0 %v458_v0  ;;  %336 = vmatprep.mubr.msk.f32.mxu0 %vm459_vm0, %v460_v1  ;;  %v50_v3 = vld [vmem:[#allocation5 + $0x8] sm:$0xff]  ;;  %v51_v4 = vld [vmem:[#allocation5 + $0x10] sm:$0xff]  ;;  %v52_v6 = vld [vmem:[#allocation5 + $0x18] sm:$0xff]  ;;  %v461_v16 = vmov 1983009808   ;;  %vm183_vm1 = vcmask 1041408  }
  0x29   :  { %v340_v5 = vpack.c.bf16 %v50_v3, %v49_v2  ;;  %v343_v7 = vpack.c.bf16 %v52_v6, %v51_v4  ;;  %v53_v8 = vld [vmem:[#allocation5 + $0x20] sm:$0xff]  ;;  %v54_v9 = vld [vmem:[#allocation5 + $0x28] sm:$0xff]  ;;  %v55_v11 = vld [vmem:[#allocation5 + $0x30] sm:$0xff]  ;;  %v77_v17 = vunpack.c.l.s4 %v461_v16  ;;  %v512_v23 = vshrl.u32 %v79_v18, 7 }
  0x2a   :  { %v346_v10 = vpack.c.bf16 %v54_v9, %v53_v8  ;;  %v56_v12 = vld [vmem:[#allocation5 + $0x38] sm:$0xff]  ;;  %v57_v14 = vld [vmem:[#allocation5 + $0x40] sm:$0xff]  ;;  %v58_v15 = vld [vmem:[#allocation5 + $0x48] sm:$0xff]  ;;  %vm222_vm2 = vcmask 1041409   ;;  %vm225_vm3 = vcmask 1042434   ;;  %vm228_vm4 = vcmask 1042432  }
  0x2b   :  { %341 = vmatpush3.bf16.msra.mxu0 %v340_v5  ;;  %v349_v13 = vpack.c.bf16 %v56_v12, %v55_v11  ;;  %v352_v19 = vpack.c.bf16 %v58_v15, %v57_v14  ;;  %v59_v20 = vld [vmem:[#allocation5 + $0x50] sm:$0xff]  ;;  %v60_v21 = vld [vmem:[#allocation5 + $0x58] sm:$0xff]  ;;  %v78_v22 = vunpack.c.0.s8 %v77_v17  ;;  %v61_v27 = vld [vmem:[#allocation5 + $0x60] sm:$0xff] }
  0x2c   :  { %342 = vmatprep.subr.bf16.mxu0 %v458_v0  ;;  %v355_v24 = vpack.c.bf16 %v60_v21, %v59_v20  ;;  %v514_v25 = vld [vmem:[#allocation2] sm:$0x3]  ;;  %v516_v26 = vld [vmem:[#allocation2 + $0x2] sm:$0x3]  ;;  %v62_v28 = vld [vmem:[#allocation5 + $0x68] sm:$0xff] }
  0x2d   :  { %v75_v29 = vcombine.low %v514_v25, %v516_v26  ;;  %v81_v30 = vsub.s32 %v78_v22, %v512_v23  ;;  %v358_v31 = vpack.c.bf16 %v62_v28, %v61_v27  ;;  %v521_v32 = vld [vmem:[#allocation2 + $0x4] sm:$0x3]  ;;  %v63_v33 = vld [vmem:[#allocation5 + $0x70] sm:$0xff]  ;;  %v285_v39 = vld [vmem:[%s553_s2] ss:$0 sm:$0xff] }
  0x2e   :  { %v64_v34 = vld [vmem:[#allocation5 + $0x78] sm:$0xff] }
  0x2f   :  { %344 = vmatpush3.bf16.msra.mxu0 %v343_v7  ;;  %v82_v35 = vrot.slane %v75_v29, %v81_v30  ;;  %v89_v36 = vrot.slane %v521_v32, %v81_v30  ;;  %v361_v37 = vpack.c.bf16 %v64_v34, %v63_v33  ;;  %v286_v8 = vld [vmem:[%s554_s3] ss:$0 sm:$0xff]  ;;  %s462_s3 = smov [#allocation7]  }
  0x30   :  { %345 = vmatprep.subr.bf16.mxu0 %v458_v0  ;;  %s275_s18 = sshll.u32 %s462_s3, 4  ;;  %s276_s18 = int_to_ptr.vmem [resolvable:$true] %s275_s18 }
  0x31   :  { %v90_v38 = vcombine.low %v82_v35, %v89_v36  ;;  %s424_s19 = scalar_lea.vmem %s276_s18, 32  ;;  %p429_p3 = scmp.lt.s32.totalorder %s276_s18, %s276_s18 }
  0x32   :  { %p425_p2 = scmp.ne.s32.totalorder %s276_s18, %s424_s19  ;;  %p430_p4 = scmp.lt.s32.totalorder %s424_s19, %s424_s19 }
  0x33   :  { %347 = vmatpush3.bf16.msra.mxu0 %v346_v10 }
  0x34   :  { %348 = vmatprep.subr.bf16.mxu0 %v458_v0  ;;  %p431_p5 = por %p430_p4, %p429_p3 }
  0x36   :  { %p432_p6 = pnand %p431_p5, %p425_p2 }
  0x37   :  { %350 = vmatpush3.bf16.msra.mxu0 %v349_v13 }
  0x38   :  { %351 = vmatprep.subr.bf16.mxu0 %v458_v0 }
  0x3b   :  { %353 = vmatpush3.bf16.msra.mxu0 %v352_v19 }
  0x3c   :  { %354 = vmatprep.subr.bf16.mxu0 %v458_v0 }
  0x3f   :  { %356 = vmatpush3.bf16.msra.mxu0 %v355_v24 }
  0x40   :  { %357 = vmatprep.subr.bf16.mxu0 %v458_v0 }
  0x43   :  { %359 = vmatpush3.bf16.msra.mxu0 %v358_v31 }
  0x44   :  { %360 = vmatprep.subr.bf16.mxu0 %v458_v0 }
  0x47   :  { %362 = vmatpush3.bf16.msra.mxu0 %v361_v37 }
  0x4a   :  { %337 = vmatmul.mubr.f32.vlgmr.msra.gmra.mrb[0].mxu0 %v90_v38 }
 0x11d   :  { %v158_v40 = vpop.f32.mrb[0].mxu0 }
 0x11e   :  { %v159_v41 = vadd.f32 %v285_v39, %v158_v40  ;;  %v338_v42 = vpop.f32.mrb[1].mxu0  ;;  %v253_v39 = vsub.s32 0, %v512_v23  ;;  %v258_v40 = vsub.s32 1, %v512_v23 }
 0x120   :  { %374 = vtanh.f32 %v159_v41  ;;  %v264_v41 = vsub.s32 2, %v512_v23 }
 0x12a   :  { %v375_v43 = vpop.eup %374 }
 0x12b   :  { %v164_v44 = vcombine.high %v375_v43, %v375_v43  ;;  %v171_v45 = vrot.slane %v375_v43, %v81_v30 }
 0x12d   :  { %v178_v46 = vrot.slane %v164_v44, %v81_v30  ;;  %v179_v47 = vcombine.high %v171_v45, %v171_v45  ;;  %v184_v48 = vsel %vm183_vm1, %v171_v45, 0.0 }
 0x12e   :  { %v185_v49 = vrot.slane %v184_v48, 4 }
 0x12f   :  { %v191_v50 = vsel %vm183_vm1, %v179_v47, 0.0  ;;  %v198_v51 = vsel %vm183_vm1, %v178_v46, 0.0 }
 0x130   :  { %v186_v52 = vadd.f32 %v185_v49, %v184_v48  ;;  %v192_v53 = vrot.slane %v191_v50, 4  ;;  %v199_v54 = vrot.slane %v198_v51, 4 }
 0x132   :  { %v187_v55 = vrot.slane %v186_v52, 2  ;;  %v193_v56 = vadd.f32 %v192_v53, %v191_v50  ;;  %v200_v57 = vadd.f32 %v199_v54, %v198_v51 }
 0x134   :  { %v188_v58 = vadd.f32 %v187_v55, %v186_v52  ;;  %v194_v59 = vrot.slane %v193_v56, 2  ;;  %v201_v60 = vrot.slane %v200_v57, 2 }
 0x136   :  { %v189_v61 = vrot.slane %v188_v58, 1  ;;  %v195_v62 = vadd.f32 %v194_v59, %v193_v56  ;;  %v202_v63 = vadd.f32 %v201_v60, %v200_v57 }
 0x138   :  { %v190_v0 = vadd.f32 %v189_v61, %v188_v58  ;;  %v196_v1 = vrot.slane %v195_v62, 1  ;;  %v203_v2 = vrot.slane %v202_v63, 1 }
 0x13a   :  { %v197_v3 = vadd.f32 %v196_v1, %v195_v62  ;;  %v204_v4 = vadd.f32 %v203_v2, %v202_v63  ;;  %v205_v5 = vmul.f32 0.125, %v190_v0 }
 0x13c   :  { %v206_v6 = vmul.f32 0.125, %v197_v3  ;;  %v207_v7 = vmul.f32 0.125, %v204_v4  ;;  %v215_v11 = vmul.f32 %v286_v8, %v205_v5 }
 0x13e   :  { %v216_v9 = vmul.f32 %v286_v8, %v206_v6  ;;  %v217_v10 = vmul.f32 %v286_v8, %v207_v7 }
 0x140   :  { %v221_v12 = vrot.slane %v216_v9, 7  ;;  %v224_v13 = vrot.slane %v217_v10, 6 }
 0x142   :  { %v223_v14 = vsel %vm222_vm2, %v221_v12, %v215_v11 }
 0x143   :  { %v226_v15 = vsel %vm225_vm3, %v224_v13, %v223_v14 }
 0x144   :  { %v229_v16 = vsel %vm228_vm4, %v226_v15, 0.0 }
 0x145   :  { %230 = vadd.xlane.f32.xlu0 %v229_v16 }
 0x1d2   :  { %v231_v17 = vpop.xlane.xlu0 %230 }
 0x1d3   :  { %v232_v18 = vsel %vm228_vm4, %v231_v17, -inf }
 0x1d4   :  { %v233_v19 = vrot.slane %v232_v18, 4 }
 0x1d6   :  { %v234_v20 = vmax.f32 %v232_v18, %v233_v19 }
 0x1d8   :  { %v235_v21 = vrot.slane %v234_v20, 2 }
 0x1da   :  { %v236_v22 = vmax.f32 %v234_v20, %v235_v21 }
 0x1dc   :  { %v237_v24 = vrot.slane %v236_v22, 1 }
 0x1de   :  { %v238_v27 = vmax.f32 %v236_v22, %v237_v24 }
 0x1e0   :  { %v239_v28 = vsub.f32 %v231_v17, %v238_v27 }
 0x1e2   :  { %v240_v29 = vmul.f32 1.442695, %v239_v28 }
 0x1e4   :  { %376 = vpow2.f32 %v240_v29 }
 0x1ee   :  { %v377_v30 = vpop.eup %376 }
 0x1ef   :  { %v242_v31 = vsel %vm228_vm4, %v377_v30, 0.0 }
 0x1f0   :  { %v243_v33 = vrot.slane %v242_v31, 4 }
 0x1f2   :  { %v244_v34 = vadd.f32 %v243_v33, %v242_v31 }
 0x1f4   :  { %v245_v35 = vrot.slane %v244_v34, 2 }
 0x1f6   :  { %v246_v36 = vadd.f32 %v245_v35, %v244_v34 }
 0x1f8   :  { %v247_v37 = vrot.slane %v246_v36, 1 }
 0x1fa   :  { %v248_v38 = vadd.f32 %v247_v37, %v246_v36 }
 0x1fc   :  { %378 = vrcp.f32 %v248_v38 }
 0x206   :  { %v379_v42 = vpop.eup %378 }
 0x207   :  { %v250_v43 = vmul.f32 %v379_v42, %v377_v30 }
 0x209   :  { %v254_v44 = vrot.slane %v250_v43, %v253_v39  ;;  %v259_v45 = vrot.slane %v250_v43, %v258_v40  ;;  %v265_v46 = vrot.slane %v250_v43, %v264_v41 }
 0x20b   :  { %v255_v47 = vmul.f32 %v254_v44, %v514_v25  ;;  %v260_v48 = vmul.f32 %v259_v45, %v516_v26  ;;  %v266_v50 = vmul.f32 %v265_v46, %v521_v32 }
 0x20d   :  { %v261_v49 = vadd.f32 %v260_v48, %v255_v47 }
 0x20f   :  { %v267_v51 = vadd.f32 %v266_v50, %v261_v49 }
 0x211   :  { %268 = vst [vmem:[#allocation7] sm:$0x3] %v267_v51 }
 0x212   :  { %435 = shalt.err (!%p432_p6)
}
 0x213   :  { %s436_s22 = scalar_lea.hbm %s555_s4, 32 }
 0x214   :  { %p437_p7 = scmp.ne.s32.totalorder %s555_s4, %s436_s22  ;;  %p440_p8 = scmp.lt.u32.totalorder %s436_s22, %s555_s4 }
 0x216   :  { %p442_p9 = pnand %p440_p8, %p437_p7 }
 0x218   :  { %445 = shalt.err (!%p442_p9)
}
 0x219   :  { %278 = dma.vmem_to_hbm [thread:$0]  %s276_s18, 32, %s555_s4, [#allocation4]  }
 0x21a   :  { %450 = dma.done.wait [#allocation4], 32  }
 0x21b   :  { %451 = vsyncadd [#allocation4], 4294967264 }
 0x21c   :  { %282 = vsyncpa [#allocation3], 1 }
 0x21d   :  { %283 = vsyncpa [#allocation6], 1 }
 0x21e   :  { %284 = vsyncpa [#allocation4], 1 }

</bundles_post_ra>
